<compile_context>
chip_gen: v7x
topology: tpu7x:2x2x1
jax: 0.10.0
libtpu: 0.0.40
codegen_flags: <defaults>
</compile_context>

<pallas_src>
import functools

import jax
import jax.numpy as jnp
from jax import lax
from jax.experimental import pallas as pl
from jax.experimental.pallas import tpu as pltpu


def _pick_tile(n, preferred):
    """Largest tile <= preferred that divides n and is a multiple of 8 (or n)."""
    if n % preferred == 0:
        return preferred
    for t in range(min(preferred, n), 0, -1):
        if n % t == 0 and (t % 8 == 0 or t == n):
            return t
    return n


def _has_bf16_eup():
    """True on TPU generations with bf16 VPU/EUP (v6e, v7x); False elsewhere."""
    try:
        kind = jax.devices()[0].device_kind.lower()
    except Exception:
        return False
    return ("v6" in kind) or ("v7" in kind)


# ---------------------------------------------------------------------------
# Kernel A: fused QKV projection.   qkv = x @ Wqkv^T   (scale folded into Wq)
# ---------------------------------------------------------------------------
def _qkv_proj_kernel(x_ref, w_ref, q_ref, k_ref, v_ref):
    # x_ref: (1, tr, Din) f32;  w_ref: (Din, 3E) bf16 (Q columns pre-scaled).
    x = x_ref[0].astype(jnp.bfloat16)
    qkv = jnp.dot(x, w_ref[...], preferred_element_type=jnp.float32)   # (tr, 3E)
    E = q_ref.shape[-1]
    q_ref[0] = qkv[:, 0 * E:1 * E].astype(q_ref.dtype)                  # bf16
    k_ref[0] = qkv[:, 1 * E:2 * E].astype(k_ref.dtype)                  # bf16
    v_ref[0] = qkv[:, 2 * E:3 * E].astype(v_ref.dtype)                  # bf16


# ---------------------------------------------------------------------------
# Kernel B: attention (single-pass softmax, K/V resident) + projection + bias
#           + residual(V)
# ---------------------------------------------------------------------------
def _attn_kernel(q_ref, k_ref, v_ref, wp_ref, bp_ref, o_ref, *, bf16_exp):
    # q_ref: (1, tq, E) bf16, pre-scaled.
    # k_ref / v_ref: (1, N, E) bf16, resident per batch (index_map ignores qi).
    # wp_ref: (E, E) bf16;  bp_ref: (1, E) f32;  o_ref: (1, tq, E).
    qi = pl.program_id(1)
    tq = q_ref.shape[1]

    q = q_ref[0]                                   # (tq, E)
    k = k_ref[0]                                   # (N, E)
    v = v_ref[0]                                   # (N, E)

    # scores = q @ k^T without materializing k.T (contract dim 1 of both).
    s = lax.dot_general(q, k, dimension_numbers=(((1,), (1,)), ((), ())),
                        preferred_element_type=jnp.float32)            # (tq, N)

    # Single-pass row softmax over the full kv extent.
    m = jnp.max(s, axis=-1, keepdims=True)
    if bf16_exp:
        # bf16 EUP (v6e/v7x): ~2x exp throughput; p feeds a bf16 matmul anyway.
        p = jnp.exp((s - m).astype(jnp.bfloat16))                       # (tq, N)
        l = jnp.sum(p.astype(jnp.float32), axis=-1, keepdims=True)      # (tq, 1)
    else:
        # v5e has no bf16 VALU/EUP -> keep f32 exp there.
        p32 = jnp.exp(s - m)
        l = jnp.sum(p32, axis=-1, keepdims=True)
        p = p32.astype(jnp.bfloat16)

    ctx = jnp.dot(p, v, preferred_element_type=jnp.float32)             # (tq, E)
    ctx = ctx * pl.reciprocal(l, approx=True)                           # EUP slot

    proj = jnp.dot(ctx.astype(jnp.bfloat16), wp_ref[...],
                   preferred_element_type=jnp.float32) + bp_ref[...]

    # Residual: V rows of this q tile, sliced from the resident V block
    # (no extra HBM input stream).
    row0 = pl.multiple_of(qi * tq, tq)
    vres = v_ref[0, pl.ds(row0, tq), :].astype(jnp.float32)
    o_ref[0] = (proj + vres).astype(o_ref.dtype)


# ---------------------------------------------------------------------------
# Wrapper
# ---------------------------------------------------------------------------
def token_transformer_attention(x, w_qkv, w_proj, b_proj, *,
                                embedding_dimension=64, num_heads=1):
    """Pallas implementation of TokenTransformerAttention.forward.

    x:      (B, N, Din) float32
    w_qkv:  (3*E, Din)  float32   (PyTorch Linear weight layout, no bias)
    w_proj: (E, E)      float32   (PyTorch Linear weight layout)
    b_proj: (E,)        float32
    """
    assert num_heads == 1, "this kernel reproduces the default num_heads=1 path"
    B, N, Din = x.shape
    E = embedding_dimension
    head_dim = E // num_heads
    scale = float(head_dim) ** -0.5

    # Host-side weight prep: transpose to row-major x @ W layout, fold the
    # softmax scale into the Q columns, pre-cast to bf16 (MXU operand dtype).
    wqkv_t = jnp.transpose(w_qkv)                                   # (Din, 3E)
    wqkv_t = wqkv_t.at[:, :E].multiply(scale).astype(jnp.bfloat16)
    wp_t = jnp.transpose(w_proj).astype(jnp.bfloat16)               # (E, E)
    bp = b_proj.reshape(1, E).astype(jnp.float32)                   # (1, E)

    cparams = pltpu.CompilerParams(
        dimension_semantics=("parallel", "parallel"),
        vmem_limit_bytes=48 * 1024 * 1024)   # headroom vs v7x's 64 MiB VMEM

    # ---- Kernel A: fused QKV projection -----------------------------------
    tr = _pick_tile(N, 256)
    q, k, v = pl.pallas_call(
        _qkv_proj_kernel,
        out_shape=(
            jax.ShapeDtypeStruct((B, N, E), jnp.bfloat16),   # q (pre-scaled)
            jax.ShapeDtypeStruct((B, N, E), jnp.bfloat16),   # k
            jax.ShapeDtypeStruct((B, N, E), jnp.bfloat16),   # v
        ),
        grid_spec=pltpu.PrefetchScalarGridSpec(
            num_scalar_prefetch=0,
            grid=(B, N // tr),
            in_specs=[
                pl.BlockSpec((1, tr, Din), lambda b, r: (b, r, 0)),
                pl.BlockSpec((Din, 3 * E), lambda b, r: (0, 0)),
            ],
            out_specs=[
                pl.BlockSpec((1, tr, E), lambda b, r: (b, r, 0)),
                pl.BlockSpec((1, tr, E), lambda b, r: (b, r, 0)),
                pl.BlockSpec((1, tr, E), lambda b, r: (b, r, 0)),
            ],
        ),
        compiler_params=cparams,
    )(x, wqkv_t)

    # ---- Kernel B: attention + projection + residual (K/V resident) -------
    tq = _pick_tile(N, 256)
    kernel_b = functools.partial(_attn_kernel, bf16_exp=_has_bf16_eup())
    out = pl.pallas_call(
        kernel_b,
        out_shape=jax.ShapeDtypeStruct((B, N, E), x.dtype),
        grid_spec=pltpu.PrefetchScalarGridSpec(
            num_scalar_prefetch=0,
            grid=(B, N // tq),
            in_specs=[
                pl.BlockSpec((1, tq, E), lambda b, qi: (b, qi, 0)),   # q tile
                pl.BlockSpec((1, N, E), lambda b, qi: (b, 0, 0)),     # K resident
                pl.BlockSpec((1, N, E), lambda b, qi: (b, 0, 0)),     # V resident
                pl.BlockSpec((E, E), lambda b, qi: (0, 0)),           # Wp^T bf16
                pl.BlockSpec((1, E), lambda b, qi: (0, 0)),           # bias
            ],
            out_specs=pl.BlockSpec((1, tq, E), lambda b, qi: (b, qi, 0)),
        ),
        compiler_params=cparams,
    )(q, k, v, wp_t, bp)
    return out


def _reference(x, w_qkv, w_proj, b_proj, E):
    # pure-JAX f32 reference mirroring the PyTorch forward (num_heads=1, dropout=0)
    q = x @ w_qkv[0 * E:1 * E, :].T
    k = x @ w_qkv[1 * E:2 * E, :].T
    v = x @ w_qkv[2 * E:3 * E, :].T
    scale = float(E) ** -0.5
    sim = jnp.einsum("bnd,bmd->bnm", q, k) * scale
    attn = jax.nn.softmax(sim, axis=-1)
    out = jnp.einsum("bnm,bmd->bnd", attn, v)
    out = out @ w_proj.T + b_proj
    return out + v


if __name__ == "__main__":
    B, N, Din, E = 2, 8, 16, 32
    key = jax.random.PRNGKey(0)
    kx, kqkv, kwp, kbp = jax.random.split(key, 4)

    x = jax.random.normal(kx, (B, N, Din), dtype=jnp.float32)
    # deterministic synthetic parameters (shapes match nn.Linear in __init__)
    w_qkv = jax.random.normal(kqkv, (3 * E, Din), dtype=jnp.float32) * 0.05
    w_proj = jax.random.normal(kwp, (E, E), dtype=jnp.float32) * 0.05
    b_proj = jax.random.normal(kbp, (E,), dtype=jnp.float32) * 0.05

    y = token_transformer_attention(x, w_qkv, w_proj, b_proj,
                                    embedding_dimension=E, num_heads=1)
    y = jax.block_until_ready(y)

    y_ref = _reference(x, w_qkv, w_proj, b_proj, E)
    assert y.shape == (B, N, E)
    # bf16 MXU operands / bf16 V residual (f32 accumulation) -> looser tolerance.
    max_err = float(jnp.max(jnp.abs(y - y_ref)))
    assert jnp.allclose(y, y_ref, atol=3e-2, rtol=3e-2), max_err

    print("KERNEL_OK")
</pallas_src>

<mosaic_0001>
module attributes {stable_mosaic.version = 11 : i64} {
  func.func @_qkv_proj_kernel(%arg0: i32, %arg1: i32, %arg2: memref<1x8x16xf32, #tpu.memory_space<vmem>>, %arg3: memref<16x96xbf16, #tpu.memory_space<vmem>>, %arg4: memref<1x8x32xbf16, #tpu.memory_space<vmem>>, %arg5: memref<1x8x32xbf16, #tpu.memory_space<vmem>>, %arg6: memref<1x8x32xbf16, #tpu.memory_space<vmem>>) attributes {dimension_semantics = [#tpu.dimension_semantics<parallel>, #tpu.dimension_semantics<parallel>], iteration_bounds = array<i64: 2, 1>, scalar_prefetch = 0 : i64, scratch_operands = 0 : i64, tpu.core_type = #tpu.core_type<tc>, window_params = [{transform_indices = @transform_0, window_bounds = array<i64: 1, 8, 16>}, {pipeline_mode = #tpu.pipeline_mode<synchronous>, transform_indices = @transform_1, window_bounds = array<i64: 16, 96>}, {transform_indices = @transform_2, window_bounds = array<i64: 1, 8, 32>}, {transform_indices = @transform_3, window_bounds = array<i64: 1, 8, 32>}, {transform_indices = @transform_4, window_bounds = array<i64: 1, 8, 32>}]} {
    %c0 = arith.constant 0 : index
    %c0_0 = arith.constant 0 : index
    %c0_1 = arith.constant 0 : index
    %0 = vector.load %arg2[%c0, %c0_0, %c0_1] : memref<1x8x16xf32, #tpu.memory_space<vmem>>, vector<1x8x16xf32>
    %1 = vector.shape_cast %0 : vector<1x8x16xf32> to vector<8x16xf32>
    %2 = arith.truncf %1 : vector<8x16xf32> to vector<8x16xbf16>
    %c0_2 = arith.constant 0 : index
    %c0_3 = arith.constant 0 : index
    %3 = vector.load %arg3[%c0_2, %c0_3] : memref<16x96xbf16, #tpu.memory_space<vmem>>, vector<16x96xbf16>
    %cst = arith.constant dense<0.000000e+00> : vector<8x96xf32>
    %4 = tpu.matmul %2, %3, %cst {dimension_numbers = #tpu.dot_dimension_numbers<[1], [0], [0], [1], [0, 0, 1, 1], [], []>} : vector<8x16xbf16>, vector<16x96xbf16>, vector<8x96xf32> -> vector<8x96xf32>
    %5 = vector.extract_strided_slice %4 {offsets = [0, 0], sizes = [8, 32], strides = [1, 1]} : vector<8x96xf32> to vector<8x32xf32>
    %6 = arith.truncf %5 : vector<8x32xf32> to vector<8x32xbf16>
    %c0_4 = arith.constant 0 : index
    %c0_5 = arith.constant 0 : index
    %c0_6 = arith.constant 0 : index
    %7 = vector.load %arg4[%c0_4, %c0_5, %c0_6] : memref<1x8x32xbf16, #tpu.memory_space<vmem>>, vector<1x8x32xbf16>
    %8 = vector.shape_cast %7 : vector<1x8x32xbf16> to vector<8x32xbf16>
    %9 = vector.shape_cast %6 : vector<8x32xbf16> to vector<1x8x32xbf16>
    tpu.vector_store %arg4[%c0_4, %c0_5, %c0_6], %9 {strides = array<i32>} : memref<1x8x32xbf16, #tpu.memory_space<vmem>>, vector<1x8x32xbf16>,
    %10 = vector.extract_strided_slice %4 {offsets = [0, 32], sizes = [8, 32], strides = [1, 1]} : vector<8x96xf32> to vector<8x32xf32>
    %11 = arith.truncf %10 : vector<8x32xf32> to vector<8x32xbf16>
    %c0_7 = arith.constant 0 : index
    %c0_8 = arith.constant 0 : index
    %c0_9 = arith.constant 0 : index
    %12 = vector.load %arg5[%c0_7, %c0_8, %c0_9] : memref<1x8x32xbf16, #tpu.memory_space<vmem>>, vector<1x8x32xbf16>
    %13 = vector.shape_cast %12 : vector<1x8x32xbf16> to vector<8x32xbf16>
    %14 = vector.shape_cast %11 : vector<8x32xbf16> to vector<1x8x32xbf16>
    tpu.vector_store %arg5[%c0_7, %c0_8, %c0_9], %14 {strides = array<i32>} : memref<1x8x32xbf16, #tpu.memory_space<vmem>>, vector<1x8x32xbf16>,
    %15 = vector.extract_strided_slice %4 {offsets = [0, 64], sizes = [8, 32], strides = [1, 1]} : vector<8x96xf32> to vector<8x32xf32>
    %16 = arith.truncf %15 : vector<8x32xf32> to vector<8x32xbf16>
    %c0_10 = arith.constant 0 : index
    %c0_11 = arith.constant 0 : index
    %c0_12 = arith.constant 0 : index
    %17 = vector.load %arg6[%c0_10, %c0_11, %c0_12] : memref<1x8x32xbf16, #tpu.memory_space<vmem>>, vector<1x8x32xbf16>
    %18 = vector.shape_cast %17 : vector<1x8x32xbf16> to vector<8x32xbf16>
    %19 = vector.shape_cast %16 : vector<8x32xbf16> to vector<1x8x32xbf16>
    tpu.vector_store %arg6[%c0_10, %c0_11, %c0_12], %19 {strides = array<i32>} : memref<1x8x32xbf16, #tpu.memory_space<vmem>>, vector<1x8x32xbf16>,
    return
  }
  func.func @transform_0(%arg0: i32, %arg1: i32) -> (i32, i32, i32) {
    %c0_i32 = arith.constant 0 : i32
    %c0_i32_0 = arith.constant 0 : i32
    return %arg0, %arg1, %c0_i32 : i32, i32, i32
  }
  func.func @transform_1(%arg0: i32, %arg1: i32) -> (i32, i32) {
    %c0_i32 = arith.constant 0 : i32
    %c0_i32_0 = arith.constant 0 : i32
    %c0_i32_1 = arith.constant 0 : i32
    return %c0_i32, %c0_i32_0 : i32, i32
  }
  func.func @transform_2(%arg0: i32, %arg1: i32) -> (i32, i32, i32) {
    %c0_i32 = arith.constant 0 : i32
    %c0_i32_0 = arith.constant 0 : i32
    return %arg0, %arg1, %c0_i32 : i32, i32, i32
  }
  func.func @transform_3(%arg0: i32, %arg1: i32) -> (i32, i32, i32) {
    %c0_i32 = arith.constant 0 : i32
    %c0_i32_0 = arith.constant 0 : i32
    return %arg0, %arg1, %c0_i32 : i32, i32, i32
  }
  func.func @transform_4(%arg0: i32, %arg1: i32) -> (i32, i32, i32) {
    %c0_i32 = arith.constant 0 : i32
    %c0_i32_0 = arith.constant 0 : i32
    return %arg0, %arg1, %c0_i32 : i32, i32, i32
  }
}

</mosaic_0001>

<bundles_post_ra>
// kernel: tpu_custom_call.1
= control target key start
LH: loop header
LB: loop body
LE: loop exit
PB: predicated region body
PF: predicated region fallthrough
CT: control target
= control target key end

     0   :  { %10 = vsyncpa [#allocation3], 0  ;;  %s1203_s0 = inlined_call_operand.hbm [shape: f32[2,8,16], index: 0, kind: input, shape index: {}]   ;;  %s1204_s1 = inlined_call_operand.hbm [shape: bf16[16,96], index: 1, kind: input, shape index: {}]   ;;  %s1205_s2 = inlined_call_operand.hbm [shape: bf16[2,8,32], index: 2, kind: output, shape index: {0}]   ;;  %s1206_s3 = inlined_call_operand.hbm [shape: bf16[2,8,32], index: 3, kind: output, shape index: {1}]   ;;  %s1207_s4 = inlined_call_operand.hbm [shape: bf16[2,8,32], index: 4, kind: output, shape index: {2}]  }
   0x1   :  { %12 = vsyncpa [#allocation3 + $0x1], 0 }
   0x2   :  { %13 = vsyncpa [#allocation6], 0 }
   0x3   :  { %14 = vsyncpa [#allocation4], 0 }
   0x4   :  { %16 = vsyncpa [#allocation4 + $0x1], 0 }
   0x5   :  { %17 = vsyncpa [#allocation9], 0 }
   0x6   :  { %19 = vsyncpa [#allocation9 + $0x1], 0  ;;  %s907_s15 = smov 0   ;;  %s909_s16 = smov 0  }
   0x7   :  { %s911_s17 = smov 0   ;;  %s913_s18 = smov 0  }
   0x8   :  { %s915_s19 = smov 0   ;;  %s917_s20 = smov 0  }
   0x9 LB: > { %s938_s21 = sadd.s32 4294967295, %s869_s20   ;;  %s543_s22 = sadd.s32 4294967294, %s869_s20   ;;  %s869_s20 = sphi %s917_s20, %s25_s20   ;;  %s865_s19 = sphi %s915_s19, %s1229_s19   ;;  %s861_s18 = sphi %s913_s18, %s1228_s18   ;;  %s857_s17 = sphi %s911_s17, %s1227_s17   ;;  %s853_s16 = sphi %s909_s16, %s1226_s16   ;;  %s849_s15 = sphi %s907_s15, %s1225_s15  }
   0xa   : > { %p59_p0 = scmp.ne.s32.totalorder %s853_s16, %s849_s15  ;;  %p1208_p1 = scmp.eq.s32.totalorder %s938_s21, 0 }
   0xb   : > { %p112_p3 = scmp.eq.s32.totalorder %s543_s22, 1  ;;  %p544_p5 = scmp.ge.s32.totalorder %s869_s20, 1 }
   0xc   : > { %p949_p4 = por %p1208_p1, %p59_p0  ;;  %p175_p7 = scmp.lt.s32.totalorder %s869_s20, 3 }
   0xd   : > { %p954_p6 = por %p112_p3, %p59_p0  ;;  %s871_s26 = smov [#allocation5]  }
   0xe   : > { %s1211_s23 = scalar_select %p949_p4, 1, 0 }
   0xf   : > { %s1212_s24 = scalar_select %p954_p6, 1, 0 }
  0x10   : > { %p959_p8 = pnand %p544_p5, %p175_p7  ;;  %s187_s27 = sshll.u32 %s871_s26, 4  ;;  %s188_s27 = int_to_ptr.vmem [resolvable:$true] %s187_s27 }
  0x11   : > { %s37_s29 = sadd.s32 1, %s865_s19  ;;  %s665_s6 = scalar_lea.hbm %s1204_s1, 128 }
  0x12   : > { %s1213_s25 = scalar_select %p959_p8, 1, 0 }
  0x13   : > { %p587_p9 = pneg %p959_p8  ;;  %p666_p12 = scmp.ne.s32.totalorder %s1204_s1, %s665_s6 }
  0x14   : > { %p672_p5 = scmp.lt.u32.totalorder %s665_s6, %s1204_s1 }
  0x15   : > { %p968_p11 = pnand %p587_p9, %p1208_p1 }
  0x17   : > { %p667_p13 = pneg %p968_p11 }
  0x19   : > { %p668_p0 = pnand %p667_p13, %p666_p12 }
  0x1b   : > { %p669_p3 = pneg %p668_p0 }
  0x1d   : > { %p674_p7 = pnand %p672_p5, %p669_p3 }
  0x1f   : > { %677 = shalt.err (!%p674_p7)
}
  0x20   : > { %s678_s11 = scalar_lea.vmem %s188_s27, 128  ;;  %p686_p2 = scmp.lt.s32.totalorder %s188_s27, %s188_s27 }
  0x21   : > { %p679_p9 = scmp.ne.s32.totalorder %s188_s27, %s678_s11  ;;  %p687_p6 = scmp.lt.s32.totalorder %s678_s11, %s678_s11 }
  0x23   : > { %p681_p10 = pnand %p679_p9, %p667_p13  ;;  %p688_p4 = por %p687_p6, %p686_p2 }
  0x25   : > { %p682_p1 = pneg %p681_p10 }
  0x27   : > { %p689_p8 = pnand %p688_p4, %p682_p1 }
  0x29   : > { %692 = shalt.err (!%p689_p8)
}
  0x2a   : > { %s872_s12 = smov 64   ;;  %s873_s13 = smov 4  }
  0x2b   : > { %590 = dma.hbm_to_vmem [thread:$0]  (!%p968_p11), %s1204_s1, 128, %s188_s27, [#allocation6], %s872_s12, %s872_s12, %s873_s13  }
  0x2c   : > { %p39_p1 = scmp.ge.s32.totalorder %s37_s29, 2  ;;  %s46_s30 = sadd.s32 1, %s857_s17 }
  0x2d   : > { %p53_p2 = scmp.ne.s32.totalorder %s857_s17, %s853_s16  ;;  %p54_p4 = scmp.eq.s32.totalorder %s869_s20, 0 }
  0x2e   : > { %s1231_s29 = smov (%p39_p1, %s37_s29), 0  ;;  %p1216_p8 = scmp.eq.s32.totalorder %s938_s21, 1 }
  0x2f   : > { %p995_p6 = por %p54_p4, %p53_p2  ;;  %s41_s28 = ssub.s32 %s865_s19, %s1231_s29 }
  0x30   : > { %p1001_p10 = por %p1216_p8, %p53_p2  ;;  %p606_p12 = scmp.lt.s32.totalorder %s869_s20, 2 }
  0x31   : > { %p44_p11 = scmp.eq.s32.totalorder %s41_s28, 0  ;;  %s201_s27 = sand.u32 1, %s857_s17  }
  0x32   : > { %s547_s7 = sshll.u32 %s201_s27, 3  ;;  %s548_s9 = sshll.u32 %s865_s19, 7 }
  0x33   : > { %s1010_s8 = scalar_select %p44_p11, %s857_s17, %s46_s30  }
  0x34   : > { %s1016_s12 = scalar_lea.hbm %s1203_s0, %s548_s9  ;;  %s205_s13 = scalar_lea.vmem [#allocation2], %s547_s7 }
  0x35   : > { %s213_s14 = sshll.u32 %s205_s13, 4  ;;  %p1022_p13 = pnand %p606_p12, %p995_p6  ;;  %s1018_s14 = int_to_ptr.vmem [resolvable:$true] %s213_s14 }
  0x36   : > { %s202_s30 = scalar_lea.sflag [#allocation3], %s201_s27  ;;  %s693_s28 = scalar_lea.hbm %s1016_s12, 128 }
  0x37   : > { %p694_p0 = scmp.ne.s32.totalorder %s1016_s12, %s693_s28  ;;  %p695_p3 = pneg %p1022_p13 }
  0x38   : > { %s698_s10 = scalar_lea.hbm %s1203_s0, 256  ;;  %p699_p9 = scmp.lt.u32.totalorder %s1016_s12, %s1203_s0 }
  0x39   : > { %p696_p5 = pnand %p695_p3, %p694_p0  ;;  %p700_p1 = scmp.lt.u32.totalorder %s698_s10, %s693_s28 }
  0x3a   : > { %p702_p4 = scmp.lt.u32.totalorder %s693_s28, %s1016_s12 }
  0x3b   : > { %p697_p7 = pneg %p696_p5  ;;  %p701_p2 = por %p700_p1, %p699_p9 }
  0x3d   : > { %p703_p6 = por %p702_p4, %p701_p2 }
  0x3f   : > { %p704_p8 = pnand %p703_p6, %p697_p7 }
  0x41   : > { %707 = shalt.err (!%p704_p8)
}
  0x42   : > { %s708_s27 = scalar_lea.vmem %s1018_s14, 128  ;;  %s874_s13 = smov [#allocation2]  }
  0x43   : > { %p709_p12 = scmp.ne.s32.totalorder %s1018_s14, %s708_s27  ;;  %s713_s7 = sshll.u32 %s874_s13, 4  ;;  %s714_s7 = int_to_ptr.vmem [resolvable:$false] %s713_s7 }
  0x44   : > { %s715_s9 = scalar_lea.vmem %s714_s7, 256  ;;  %p716_p5 = scmp.lt.s32.totalorder %s1018_s14, %s714_s7 }
  0x45   : > { %p711_p11 = pnand %p709_p12, %p695_p3  ;;  %p717_p9 = scmp.lt.s32.totalorder %s715_s9, %s708_s27 }
  0x47   : > { %p712_p0 = pneg %p711_p11  ;;  %p718_p1 = por %p717_p9, %p716_p5 }
  0x49   : > { %p719_p2 = pnand %p718_p1, %p712_p0 }
  0x4b   : > { %722 = shalt.err (!%p719_p2)
}
  0x4c   : > { %594 = dma.hbm_to_vmem [thread:$0]  (!%p1022_p13), %s1016_s12, 128, %s1018_s14, %s202_s30  }
  0x4d   : > { %p1219_p7 = scmp.ne.s32.totalorder %s1213_s25, 0 }
  0x4e   : > { %s1054_s28 = sand.u32 (!%p1219_p7), 1, %s853_s16   ;;  %p1220_p3 = scmp.ne.s32.totalorder (!%p1219_p7), %s1211_s23, 0 }
  0x4f   : > { %222 = sbr.rel (%p1219_p7) target bundleno = 461 (0x1cd), region = 28  ;;  %s550_s10 = sshll.u32 (!%p1219_p7), %s1054_s28, 3 }
  0x50   : > { %s225_s5 = scalar_lea.sflag (!%p1219_p7), [#allocation3], %s1054_s28  ;;  %s228_s11 = scalar_lea.vmem (!%p1219_p7), [#allocation2], %s550_s10 }
  0x56   : > { %832 = dma.done.wait (%p1220_p3), %s225_s5, 128  }
  0x57   : > { %834 = vsyncadd (%p1220_p3), %s225_s5, 4294967168  ;;  %p1221_p4 = scmp.eq.s32.totalorder %s938_s21, 0 }
  0x59   : > { %836 = dma.done.wait (%p1221_p4), [#allocation6], 128   ;;  %p1222_p13 = pmov %p1221_p4 }
  0x5a   : > { %v875_v0 = vmov 0.0   ;;  %vm876_vm0 = vmmov 0   ;;  %v664_v1 = vld [vmem:[#allocation5] sm:$0xff]   ;;  %v268_v2 = vld [vmem:[%s228_s11] sm:$0xff]  ;;  %vm278_vm1 = vcmask 130048   ;;  %s1067_s23 = sshll.u32 %s1054_s28, 2 }
  0x5b   : > { %838 = vsyncadd (%p1222_p13), [#allocation6], 4294967168  ;;  %569 = vmatprep.subr.bf16.mxu0 %v875_v0  ;;  %571 = vmatprep.mubr.msk.bf16.mxu0 %vm876_vm0, %v875_v0  ;;  %v269_v3 = vpack.c.bf16 %v268_v2, %v268_v2  ;;  %s1070_s25 = sshll.u32 %s861_s18, 6  ;;  %s252_s12 = scalar_lea.vmem [#allocation7], %s1067_s23  ;;  %vm323_vm2 = vcmask 257024  }
  0x5c   : > { %570 = vmatpush3.bf16.msra.mxu0 %v664_v1  ;;  %s361_s14 = sshll.u32 %s252_s12, 4  ;;  %s1077_s27 = scalar_lea.hbm %s1205_s2, %s1070_s25  ;;  %s1079_s14 = int_to_ptr.vmem [resolvable:$true] %s361_s14 }
  0x5d   : > { %s877_s18 = smov 96   ;;  %s337_s13 = scalar_lea.sflag [#allocation4], %s1054_s28 }
  0x5e   : > { %s723_s7 = scalar_lea.vmem %s1079_s14, 64  ;;  %s878_s9 = smov [#allocation7]  }
  0x5f   : > { %572 = vmatmul.mubr.msk.bf16.vlgmr.msra.gmra.mrb[0].mxu0 %vm278_vm1, %v269_v3  ;;  %p724_p6 = scmp.ne.s32.totalorder %s1079_s14, %s723_s7  ;;  %s727_s10 = sshll.u32 %s878_s9, 4  ;;  %s728_s10 = int_to_ptr.vmem [resolvable:$false] %s727_s10 }
  0x60   : > { %s729_s5 = scalar_lea.vmem %s728_s10, 128  ;;  %p730_p11 = scmp.lt.s32.totalorder %s1079_s14, %s728_s10 }
  0x61   : > { %p725_p8 = pnand %p724_p6, %p1001_p10  ;;  %p731_p0 = scmp.lt.s32.totalorder %s729_s5, %s723_s7 }
  0x63   : > { %p726_p12 = pneg %p725_p8  ;;  %p732_p5 = por %p731_p0, %p730_p11 }
  0x65   : > { %p733_p9 = pnand %p732_p5, %p726_p12 }
 0x132   : > { %v316_v4 = vpop.f32.mrb[0].mxu0 }
 0x133   : > { %v322_v5 = vpack.c.bf16 %v316_v4, %v316_v4  ;;  %v573_v6 = vpop.f32.mrb[1].mxu0 }
 0x134   : > { %v319_v7 = vpop.f32.mrb[2].mxu0 }
 0x135   : > { %328 = vrot.lane.b32.xlu0 %v322_v5, %s877_s18  ;;  %v574_v8 = vpop.f32.mrb[3].mxu0  ;;  %324 = vst.msk [vmem:[%s252_s12] sm:$0xf] %vm323_vm2, %v322_v5 }
 0x136   : > { %736 = shalt.err (!%p733_p9)
}
 0x137   : > { %s737_s28 = scalar_lea.hbm %s1077_s27, 64  ;;  %s741_s26 = scalar_lea.hbm %s1205_s2, 128 }
 0x138   : > { %p738_p1 = scmp.ne.s32.totalorder %s1077_s27, %s737_s28  ;;  %p742_p3 = scmp.lt.u32.totalorder %s1077_s27, %s1205_s2 }
 0x139   : > { %p743_p4 = scmp.lt.u32.totalorder %s741_s26, %s737_s28  ;;  %p745_p6 = scmp.lt.u32.totalorder %s737_s28, %s1077_s27 }
 0x13a   : > { %p739_p2 = pnand %p738_p1, %p1001_p10 }
 0x13b   : > { %p744_p13 = por %p743_p4, %p742_p3 }
 0x13c   : > { %p740_p7 = pneg %p739_p2 }
 0x13d   : > { %p746_p8 = por %p745_p6, %p744_p13 }
 0x13f   : > { %p747_p12 = pnand %p746_p8, %p740_p7 }
 0x141   : > { %750 = shalt.err (!%p747_p12)
}
 0x142   : > { %581 = dma.vmem_to_hbm [thread:$0]  (%p1001_p10), %s1079_s14, 64, %s1077_s27, %s337_s13  }
 0x143   : > { %s879_s7 = smov 64   ;;  %s341_s9 = sand.u32 1, %s938_s21  }
 0x144   : > { %332 = vrot.lane.b32.xlu0 %v322_v5, %s879_s7  ;;  %s259_s10 = scalar_lea.vmem [#allocation8], %s1067_s23  ;;  %s1110_s12 = scalar_lea.hbm %s1206_s3, %s1070_s25 }
 0x145   : > { %s375_s5 = sshll.u32 %s259_s10, 4  ;;  %s266_s26 = scalar_lea.vmem [#allocation10], %s1067_s23  ;;  %s1112_s5 = int_to_ptr.vmem [resolvable:$true] %s375_s5 }
 0x146   : > { %s1117_s30 = sshll.u32 %s266_s26, 4  ;;  %s1120_s21 = scalar_lea.sflag [#allocation9], %s341_s9  ;;  %s1151_s30 = int_to_ptr.vmem [resolvable:$true] %s1117_s30 }
 0x147   : > { %s751_s14 = scalar_lea.vmem %s1112_s5, 64  ;;  %s880_s27 = smov [#allocation8]  }
 0x148   : > { %p752_p11 = scmp.ne.s32.totalorder %s1112_s5, %s751_s14  ;;  %s755_s13 = sshll.u32 %s880_s27, 4  ;;  %s756_s13 = int_to_ptr.vmem [resolvable:$false] %s755_s13 }
 0x149   : > { %s757_s18 = scalar_lea.vmem %s756_s13, 128  ;;  %p758_p9 = scmp.lt.s32.totalorder %s1112_s5, %s756_s13 }
 0x14a   : > { %p753_p0 = pnand %p752_p11, %p1001_p10  ;;  %p759_p1 = scmp.lt.s32.totalorder %s757_s18, %s751_s14 }
 0x14c   : > { %p754_p5 = pneg %p753_p0  ;;  %p760_p2 = por %p759_p1, %p758_p9 }
 0x14e   : > { %p761_p7 = pnand %p760_p2, %p754_p5 }
 0x1a7   : > { %v329_v9 = vpop.permute.xlu0 %328 }
 0x1a8   : > { %331 = vst.msk [vmem:[%s259_s10] sm:$0xf] %vm323_vm2, %v329_v9 }
 0x1a9   : > { %764 = shalt.err (!%p761_p7)
}
 0x1aa   : > { %s765_s7 = scalar_lea.hbm %s1110_s12, 64  ;;  %s769_s28 = scalar_lea.hbm %s1206_s3, 128 }
 0x1ab   : > { %p766_p3 = scmp.ne.s32.totalorder %s1110_s12, %s765_s7  ;;  %p770_p6 = scmp.lt.u32.totalorder %s1110_s12, %s1206_s3 }
 0x1ac   : > { %p771_p8 = scmp.lt.u32.totalorder %s769_s28, %s765_s7  ;;  %p773_p11 = scmp.lt.u32.totalorder %s765_s7, %s1110_s12 }
 0x1ad   : > { %p767_p4 = pnand %p766_p3, %p1001_p10 }
 0x1ae   : > { %p772_p12 = por %p771_p8, %p770_p6 }
 0x1af   : > { %p768_p13 = pneg %p767_p4 }
 0x1b0   : > { %p774_p0 = por %p773_p11, %p772_p12 }
 0x1b2   : > { %p775_p5 = pnand %p774_p0, %p768_p13 }
 0x1b4   : > { %778 = shalt.err (!%p775_p5)
}
 0x1b5   : > { %582 = dma.vmem_to_hbm [thread:$0]  (%p1001_p10), %s1112_s5, 64, %s1110_s12, %s1120_s21  }
 0x1b6   : > { %s1148_s18 = scalar_lea.hbm %s1207_s4, %s1070_s25  ;;  %v333_v10 = vpop.permute.xlu0 %332  ;;  %s779_s7 = scalar_lea.vmem %s1151_s30, 64 }
 0x1b7   : > { %335 = vst.msk [vmem:[%s266_s26] sm:$0xf] %vm323_vm2, %v333_v10  ;;  %p780_p9 = scmp.ne.s32.totalorder %s1151_s30, %s779_s7  ;;  %s881_s5 = smov [#allocation10]  }
 0x1b8   : > { %s783_s12 = sshll.u32 %s881_s5, 4  ;;  %s784_s12 = int_to_ptr.vmem [resolvable:$false] %s783_s12 }
 0x1b9   : > { %p781_p1 = pnand %p780_p9, %p1001_p10  ;;  %s785_s9 = scalar_lea.vmem %s784_s12, 128 }
 0x1ba   : > { %p786_p7 = scmp.lt.s32.totalorder %s1151_s30, %s784_s12  ;;  %p787_p3 = scmp.lt.s32.totalorder %s785_s9, %s779_s7 }
 0x1bb   : > { %p782_p2 = pneg %p781_p1 }
 0x1bc   : > { %p788_p4 = por %p787_p3, %p786_p7 }
 0x1be   : > { %p789_p13 = pnand %p788_p4, %p782_p2 }
 0x1c0   : > { %792 = shalt.err (!%p789_p13)
}
 0x1c1   : > { %s793_s23 = scalar_lea.hbm %s1148_s18, 64  ;;  %s797_s10 = scalar_lea.hbm %s1207_s4, 128 }
 0x1c2   : > { %p794_p6 = scmp.ne.s32.totalorder %s1148_s18, %s793_s23  ;;  %p798_p11 = scmp.lt.u32.totalorder %s1148_s18, %s1207_s4 }
 0x1c3   : > { %p799_p0 = scmp.lt.u32.totalorder %s797_s10, %s793_s23  ;;  %p801_p9 = scmp.lt.u32.totalorder %s793_s23, %s1148_s18 }
 0x1c4   : > { %p795_p8 = pnand %p794_p6, %p1001_p10 }
 0x1c5   : > { %p800_p5 = por %p799_p0, %p798_p11 }
 0x1c6   : > { %p796_p12 = pneg %p795_p8 }
 0x1c7   : > { %p802_p1 = por %p801_p9, %p800_p5 }
 0x1c9   : > { %p803_p2 = pnand %p802_p1, %p796_p12 }
 0x1cb   : > { %806 = shalt.err (!%p803_p2)
}
 0x1cc   : > { %583 = dma.vmem_to_hbm [thread:$0]  (%p1001_p10), %s1151_s30, 64, %s1148_s18, %s1120_s21  }
 0x1cd PF: > { %s401_s27 = sand.u32 1, %s849_s15   ;;  %p1223_p7 = scmp.ne.s32.totalorder %s1212_s24, 0 }
 0x1ce   : > { %p1224_p3 = scmp.ge.s32.totalorder %s869_s20, 2  ;;  %s402_s14 = scalar_lea.sflag [#allocation4], %s401_s27 }
 0x1d0   : > { %p596_p4 = pnand %p1224_p3, %p1223_p7 }
 0x1d2   : > { %840 = dma.done.wait (!%p596_p4), %s402_s14, 64  }
 0x1d3   : > { %842 = vsyncadd (!%p596_p4), %s402_s14, 4294967232  ;;  %s410_s13 = sand.u32 1, %s543_s22  }
 0x1d4   : > { %s411_s7 = scalar_lea.sflag [#allocation9], %s410_s13 }
 0x1d5   : > { %844 = dma.done.wait (!%p596_p4), %s411_s7, 128  }
 0x1d6   : > { %846 = vsyncadd (!%p596_p4), %s411_s7, 4294967168  ;;  %s25_s20 = sadd.s32 1, %s869_s20   ;;  %s1225_s15 = smov %s853_s16 }
 0x1d7   : > { %p22_p10 = scmp.ge.s32.totalorder %s25_s20, 4   ;;  %s1226_s16 = smov %s857_s17 }
 0x1d8   : > { %s1227_s17 = smov %s1010_s8  ;;  %s1228_s18 = smov %s865_s19 }
 0x1d9   : > { %s1229_s19 = smov %s1231_s29  ;;  %24 = sbr.rel (!%p22_p10) target bundleno = 9 (0x9), region = 109 }
 0x1e0   :  { %425 = vsyncpa [#allocation3], 1 }
 0x1e1   :  { %427 = vsyncpa [#allocation3 + $0x1], 1 }
 0x1e2   :  { %428 = vsyncpa [#allocation6], 1 }
 0x1e3   :  { %429 = vsyncpa [#allocation4], 1 }
 0x1e4   :  { %431 = vsyncpa [#allocation4 + $0x1], 1 }
 0x1e5   :  { %432 = vsyncpa [#allocation9], 1 }
 0x1e6   :  { %434 = vsyncpa [#allocation9 + $0x1], 1 }

</bundles_post_ra>
